<compile_context>
chip_gen: v5e
topology: v5e:2x2
jax: 0.10.0
libtpu: 0.0.40
codegen_flags: <defaults>
</compile_context>

<pallas_src>
import jax
import jax.numpy as jnp
from jax.experimental import pallas as pl
from jax.experimental.pallas import tpu as pltpu


def siamese_head_kernel(cls_ref, wpt_ref, bp_ref, wf_ref, bf_ref, out_ref):
    """Fused Siamese scorer head.

    cls_ref : [2B, H]  f32   interleaved CLS states (pair i -> rows 2i, 2i+1)
    wpt_ref : [H, H]   bf16  BERT pooler weight, PRE-transposed (in x out)
    bp_ref  : [1, H]   f32   BERT pooler bias
    wf_ref  : [1, H]   f32   fc weight (Linear(H, 1))
    bf_ref  : [1]      f32   fc bias (SMEM scalar)
    out_ref : [2B, 1]  f32   scores (reshaped to [B, 2] by the wrapper)
    """
    # bf16 cast of the activations happens here, in vregs (no HBM traffic).
    # Weight is already bf16 + transposed, so this is a plain (M,K)x(K,N)
    # MXU matmul with f32 accumulation — no in-kernel transpose.
    x = jnp.dot(cls_ref[...].astype(jnp.bfloat16), wpt_ref[...],
                preferred_element_type=jnp.float32)            # [2B, H] f32

    p = jnp.tanh(x + bp_ref[...])                              # pooler output

    # fc: Linear(H, 1) as VPU multiply + lane reduce (XLU), not an N=1 matmul.
    s = jnp.sum(p * wf_ref[...], axis=-1, keepdims=True)       # [2B, 1]
    out_ref[...] = s + bf_ref[0]


def prepare_siamese_params(params):
    """One-time parameter preparation (call at init / checkpoint-load time).

    Transposes the pooler weight to (in, out) and casts it to bf16 so that no
    per-call HBM cast / transpose is ever needed.
    """
    H = params["pooler_w"].shape[0]
    return {
        "pooler_wt": jnp.asarray(params["pooler_w"].T, dtype=jnp.bfloat16),  # [H_in, H_out]
        "pooler_b": params["pooler_b"].reshape(1, H).astype(jnp.float32),    # [1, H]
        "fc_w": params["fc_w"].reshape(1, H).astype(jnp.float32),            # [1, H]
        "fc_b": params["fc_b"].reshape(1).astype(jnp.float32),               # [1]
    }


def siamese_forward(h1, h2, prepared):
    """h1, h2: [B, S, H] BERT last_hidden_state for (article, summary1/2)."""
    B, _, H = h1.shape

    # Interleave the two branches: rows (2i, 2i+1) = (cls1[i], cls2[i]).
    # Stays f32 (tiny: 2*B*H elements); the bf16 cast is done in-kernel so no
    # extra cast fusion / HBM round trip precedes the kernel.
    # TODO(synk): fold this CLS gather into the input DMA (seq-dim blocking at
    # size 1 or a manual strided copy) to avoid materializing the [2B, H] slab.
    cls = jnp.stack([h1[:, 0, :], h2[:, 0, :]], axis=1).reshape(2 * B, H)

    cost = pl.CostEstimate(
        flops=2 * (2 * B) * H * H + 4 * (2 * B) * H,
        transcendentals=(2 * B) * H,
        bytes_accessed=(2 * B * H) * 4 + (H * H) * 2 + (2 * H) * 4 + (2 * B) * 4,
    )

    def vmem(shape):
        return pl.BlockSpec(shape, lambda i: (0,) * len(shape))

    out = pl.pallas_call(
        siamese_head_kernel,
        out_shape=jax.ShapeDtypeStruct((2 * B, 1), jnp.float32),
        grid=(1,),
        in_specs=[
            vmem((2 * B, H)),   # cls (interleaved, f32)
            vmem((H, H)),       # pooler weight (bf16, pre-transposed)
            vmem((1, H)),       # pooler bias
            vmem((1, H)),       # fc weight
            pl.BlockSpec(memory_space=pltpu.MemorySpace.SMEM),  # fc bias scalar
        ],
        out_specs=vmem((2 * B, 1)),
        cost_estimate=cost,
        compiler_params=pltpu.CompilerParams(
            dimension_semantics=("arbitrary",)),
    )(cls, prepared["pooler_wt"], prepared["pooler_b"],
      prepared["fc_w"], prepared["fc_b"])

    return out.reshape(B, 2)


def siamese_reference(h1, h2, params):
    def score(h):
        cls = h[:, 0, :]
        p = jnp.tanh(cls @ params["pooler_w"].T + params["pooler_b"])
        return p @ params["fc_w"].T + params["fc_b"]
    return jnp.concatenate([score(h1), score(h2)], axis=-1)


if __name__ == "__main__":
    B, S, H = 4, 8, 128  # small synthetic shapes (batch, seq, hidden)

    key = jax.random.PRNGKey(0)
    k_h1, k_h2, k_wp, k_bp, k_wf, k_bf = jax.random.split(key, 6)

    # Synthetic stand-ins for BERT(article, summary_i).last_hidden_state
    h1 = jax.random.normal(k_h1, (B, S, H), dtype=jnp.float32)
    h2 = jax.random.normal(k_h2, (B, S, H), dtype=jnp.float32)

    # Deterministic parameter init (shapes from Scorer.__init__ / BERT pooler)
    params = {
        "pooler_w": 0.05 * jax.random.normal(k_wp, (H, H), dtype=jnp.float32),
        "pooler_b": 0.01 * jax.random.normal(k_bp, (H,), dtype=jnp.float32),
        "fc_w": 0.05 * jax.random.normal(k_wf, (1, H), dtype=jnp.float32),
        "fc_b": 0.01 * jax.random.normal(k_bf, (1,), dtype=jnp.float32),
    }

    # One-time parameter prep (transpose + bf16 cast) — NOT in the per-call path.
    prepared = jax.block_until_ready(prepare_siamese_params(params))

    out = siamese_forward(h1, h2, prepared)
    out = jax.block_until_ready(out)

    ref = siamese_reference(h1, h2, params)
    assert out.shape == (B, 2), out.shape
    # bf16 matmul operands with f32 accumulation -> slightly looser tolerance.
    assert jnp.allclose(out, ref, rtol=2e-2, atol=2e-2), (out, ref)

    print("KERNEL_OK")
</pallas_src>

<mosaic_0001>
module attributes {stable_mosaic.version = 11 : i64} {
  func.func @siamese_head_kernel(%arg0: i32, %arg1: memref<8x128xf32, #tpu.memory_space<vmem>>, %arg2: memref<128x128xbf16, #tpu.memory_space<vmem>>, %arg3: memref<1x128xf32, #tpu.memory_space<vmem>>, %arg4: memref<1x128xf32, #tpu.memory_space<vmem>>, %arg5: memref<1xf32, #tpu.memory_space<smem>>, %arg6: memref<8x1xf32, #tpu.memory_space<vmem>>) attributes {dimension_semantics = [#tpu.dimension_semantics<arbitrary>], iteration_bounds = array<i64: 1>, scalar_prefetch = 0 : i64, scratch_operands = 0 : i64, tpu.core_type = #tpu.core_type<tc>, window_params = [{pipeline_mode = #tpu.pipeline_mode<synchronous>, transform_indices = @transform_0, window_bounds = array<i64: 8, 128>}, {pipeline_mode = #tpu.pipeline_mode<synchronous>, transform_indices = @transform_1, window_bounds = array<i64: 128, 128>}, {pipeline_mode = #tpu.pipeline_mode<synchronous>, transform_indices = @transform_2, window_bounds = array<i64: 1, 128>}, {pipeline_mode = #tpu.pipeline_mode<synchronous>, transform_indices = @transform_3, window_bounds = array<i64: 1, 128>}, {transform_indices = @transform_4, window_bounds = array<i64: 1>}, {pipeline_mode = #tpu.pipeline_mode<synchronous>, transform_indices = @transform_5, window_bounds = array<i64: 8, 1>}]} {
    %c0 = arith.constant 0 : index
    %c0_0 = arith.constant 0 : index
    %0 = vector.load %arg1[%c0, %c0_0] : memref<8x128xf32, #tpu.memory_space<vmem>>, vector<8x128xf32>
    %1 = arith.truncf %0 : vector<8x128xf32> to vector<8x128xbf16>
    %c0_1 = arith.constant 0 : index
    %c0_2 = arith.constant 0 : index
    %2 = vector.load %arg2[%c0_1, %c0_2] : memref<128x128xbf16, #tpu.memory_space<vmem>>, vector<128x128xbf16>
    %cst = arith.constant dense<0.000000e+00> : vector<8x128xf32>
    %3 = tpu.matmul %1, %2, %cst {dimension_numbers = #tpu.dot_dimension_numbers<[1], [0], [0], [1], [0, 0, 1, 1], [], []>} : vector<8x128xbf16>, vector<128x128xbf16>, vector<8x128xf32> -> vector<8x128xf32>
    %c0_3 = arith.constant 0 : index
    %c0_4 = arith.constant 0 : index
    %4 = vector.load %arg3[%c0_3, %c0_4] : memref<1x128xf32, #tpu.memory_space<vmem>>, vector<1x128xf32>
    %5 = vector.broadcast %4 : vector<1x128xf32> to vector<8x128xf32>
    %6 = arith.addf %3, %5 : vector<8x128xf32>
    %7 = math.tanh %6 : vector<8x128xf32>
    %c0_5 = arith.constant 0 : index
    %c0_6 = arith.constant 0 : index
    %8 = vector.load %arg4[%c0_5, %c0_6] : memref<1x128xf32, #tpu.memory_space<vmem>>, vector<1x128xf32>
    %9 = vector.broadcast %8 : vector<1x128xf32> to vector<8x128xf32>
    %10 = arith.mulf %7, %9 : vector<8x128xf32>
    %cst_7 = arith.constant dense<0.000000e+00> : vector<8xf32>
    %11 = vector.multi_reduction <add>, %10, %cst_7 [1] : vector<8x128xf32> to vector<8xf32>
    %12 = vector.shape_cast %11 : vector<8xf32> to vector<8x1xf32>
    %c0_8 = arith.constant 0 : index
    %13 = memref.load %arg5[%c0_8] : memref<1xf32, #tpu.memory_space<smem>>
    %14 = vector.broadcast %13 : f32 to vector<8x1xf32>
    %15 = arith.addf %12, %14 : vector<8x1xf32>
    %c0_9 = arith.constant 0 : index
    %c0_10 = arith.constant 0 : index
    %16 = vector.load %arg6[%c0_9, %c0_10] : memref<8x1xf32, #tpu.memory_space<vmem>>, vector<8x1xf32>
    tpu.vector_store %arg6[%c0_9, %c0_10], %15 {strides = array<i32>} : memref<8x1xf32, #tpu.memory_space<vmem>>, vector<8x1xf32>,
    return
  }
  func.func @transform_0(%arg0: i32) -> (i32, i32) {
    %c0_i32 = arith.constant 0 : i32
    %c0_i32_0 = arith.constant 0 : i32
    %c0_i32_1 = arith.constant 0 : i32
    return %c0_i32, %c0_i32_0 : i32, i32
  }
  func.func @transform_1(%arg0: i32) -> (i32, i32) {
    %c0_i32 = arith.constant 0 : i32
    %c0_i32_0 = arith.constant 0 : i32
    %c0_i32_1 = arith.constant 0 : i32
    return %c0_i32, %c0_i32_0 : i32, i32
  }
  func.func @transform_2(%arg0: i32) -> (i32, i32) {
    %c0_i32 = arith.constant 0 : i32
    %c0_i32_0 = arith.constant 0 : i32
    %c0_i32_1 = arith.constant 0 : i32
    return %c0_i32, %c0_i32_0 : i32, i32
  }
  func.func @transform_3(%arg0: i32) -> (i32, i32) {
    %c0_i32 = arith.constant 0 : i32
    %c0_i32_0 = arith.constant 0 : i32
    %c0_i32_1 = arith.constant 0 : i32
    return %c0_i32, %c0_i32_0 : i32, i32
  }
  func.func @transform_4(%arg0: i32) -> i32 {
    %c0_i32 = arith.constant 0 : i32
    %c0_i32_0 = arith.constant 0 : i32
    return %c0_i32 : i32
  }
  func.func @transform_5(%arg0: i32) -> (i32, i32) {
    %c0_i32 = arith.constant 0 : i32
    %c0_i32_0 = arith.constant 0 : i32
    %c0_i32_1 = arith.constant 0 : i32
    return %c0_i32, %c0_i32_0 : i32, i32
  }
}

</mosaic_0001>

<bundles_post_ra>
// kernel: tpu_custom_call.1
= control target key start
LH: loop header
LB: loop body
LE: loop exit
PB: predicated region body
PF: predicated region fallthrough
CT: control target
= control target key end

     0   :  { %11 = vsyncpa [#allocation4], 0  ;;  %s305_s0 = inlined_call_operand.hbm [shape: f32[8,128], index: 0, kind: input, shape index: {}]   ;;  %s306_s1 = inlined_call_operand.hbm [shape: bf16[128,128], index: 1, kind: input, shape index: {}]   ;;  %s307_s2 = inlined_call_operand.vmem [shape: f32[1,128], index: 2, kind: input, shape index: {}]   ;;  %s308_s3 = inlined_call_operand.vmem [shape: f32[1,128], index: 3, kind: input, shape index: {}]   ;;  %s309_s4 = inlined_call_operand.<no memory space> [shape: f32[1], index: 4, kind: input, shape index: {}]   ;;  %s310_s5 = inlined_call_operand.vmem [shape: f32[8,1], index: 5, kind: output, shape index: {}]  }
   0x1   :  { %s18_s20 = sshll.u32 %s305_s0, 4  ;;  %s19_s20 = int_to_ptr.hbm [resolvable:$true] %s18_s20 }
   0x2   :  { %12 = vsyncpa [#allocation6], 0  ;;  %s253_s21 = smov [#allocation3]   ;;  %s28_s25 = sshll.u32 %s306_s1, 4  ;;  %s29_s25 = int_to_ptr.hbm [resolvable:$true] %s28_s25 }
   0x3   :  { %s20_s22 = sshll.u32 %s253_s21, 4  ;;  %s254_s26 = smov [#allocation5]   ;;  %s21_s22 = int_to_ptr.vmem [resolvable:$true] %s20_s22 }
   0x4   :  { %23 = dma.hbm_to_vmem [thread:$0]  %s19_s20, 128, %s21_s22, [#allocation4]  }
   0x5   :  { %s30_s27 = sshll.u32 %s254_s26, 4  ;;  %s255_s28 = smov 64   ;;  %s31_s27 = int_to_ptr.vmem [resolvable:$true] %s30_s27 }
   0x6   :  { %s256_s29 = smov 4  }
   0x7   :  { %36 = dma.hbm_to_vmem [thread:$0]  %s29_s25, 1024, %s31_s27, [#allocation6], %s255_s28, %s255_s28, %s256_s29  }
   0x8   :  { %249 = dma.done.wait [#allocation4], 128  }
   0x9   :  { %250 = vsyncadd [#allocation4], 4294967168 }
   0xa   :  { %251 = dma.done.wait [#allocation6], 1024  }
   0xb   :  { %252 = vsyncadd [#allocation6], 4294966272  ;;  %v192_v0 = vld [vmem:[#allocation5 + $0x38] sm:$0xff]  ;;  %v191_v1 = vld [vmem:[#allocation5 + $0x30] sm:$0xff]  ;;  %v143_v17 = vstv %s309_s4  ;;  %vm145_vm0 = vcmask 7168  }
   0xc   :  { %121 = vmatpush.bf16.msra.mxu0 %v192_v0  ;;  %v190_v2 = vld [vmem:[#allocation5 + $0x28] sm:$0xff]  ;;  %v189_v3 = vld [vmem:[#allocation5 + $0x20] sm:$0xff]  ;;  %v188_v4 = vld [vmem:[#allocation5 + $0x18] sm:$0xff] }
   0xd   :  { %v187_v5 = vld [vmem:[#allocation5 + $0x10] sm:$0xff]  ;;  %v186_v6 = vld [vmem:[#allocation5 + $0x8] sm:$0xff]  ;;  %v185_v7 = vld [vmem:[#allocation5] sm:$0xff] }
   0xe   :  { %v51_v8 = vld [vmem:[#allocation3] sm:$0xff] }
   0xf   :  { %v52_v9 = vpack.c.bf16 %v51_v8, %v51_v8  ;;  %v197_v10 = vld [vmem:[%s307_s2] ss:$0 sm:$0xff] }
  0x10   :  { %122 = vmatpush.bf16.msra.mxu0 %v191_v1  ;;  %v198_v13 = vld [vmem:[%s308_s3] ss:$0 sm:$0xff] }
  0x14   :  { %123 = vmatpush.bf16.msra.mxu0 %v190_v2 }
  0x18   :  { %124 = vmatpush.bf16.msra.mxu0 %v189_v3 }
  0x1c   :  { %125 = vmatpush.bf16.msra.mxu0 %v188_v4 }
  0x20   :  { %126 = vmatpush.bf16.msra.mxu0 %v187_v5 }
  0x24   :  { %127 = vmatpush.bf16.msra.mxu0 %v186_v6 }
  0x28   :  { %128 = vmatpush.bf16.msra.mxu0 %v185_v7 }
  0x2b   :  { %129 = vmatmul.bf16.vlgmr.msra.gmra.mxu0 %v52_v9 }
  0xa8   :  { %v130_v11 = vpop.f32.mrf.mxu0 }
  0xa9   :  { %v131_v12 = vadd.f32 %v197_v10, %v130_v11 }
  0xab   :  { %199 = vtanh.f32 %v131_v12 }
  0xb0   :  { %v132_v14 = vpop.f32.mrf.mxu0 }
  0xb1   :  { %v200_v15 = vpop.eup %199 }
  0xb2   :  { %v139_v16 = vmul.f32 %v200_v15, %v198_v13 }
  0xb4   :  { %140 = vadd.xlane.f32.xlu0 %v139_v16 }
 0x127   :  { %v141_v18 = vpop.xlane.xlu0 %140 }
 0x128   :  { %v144_v19 = vadd.f32 %v143_v17, %v141_v18 }
 0x12a   :  { %146 = vst.msk [vmem:[%s310_s5] sm:$0xff] %vm145_vm0, %v144_v19 }
 0x12b   :  { %151 = vsyncpa [#allocation4], 1 }
 0x12c   :  { %152 = vsyncpa [#allocation6], 1 }

</bundles_post_ra>
